<compile_context>
chip_gen: v7x
topology: tpu7x:2x2x1
jax: 0.10.0
libtpu: 0.0.40
codegen_flags: <defaults>
</compile_context>

<pallas_src>
import functools

import jax
import jax.numpy as jnp
from jax.experimental import pallas as pl
from jax.experimental.pallas import tpu as pltpu

LANE = 128


def _round_up(x, m):
    return (x + m - 1) // m * m


def vanilla_rnn_kernel(ids_ref,     # SMEM (B,)        int32  token ids
                       emb_ref,     # VMEM (V, 1, Hp)  f32    padded embedding table
                       h_ref,       # VMEM (B, Hp)     f32    padded hidden state
                       w_cat_ref,   # VMEM (2*Hp, Hp)  f32    [W_ih ; W_hh] padded, (in, out)
                       b_cat_ref,   # VMEM (1, Hp)     f32    b_ih + b_hh, padded
                       w_fc_ref,    # VMEM (Hp, Op)    f32    W_fc padded, (in, out)
                       b_fc_ref,    # VMEM (1, Op)     f32    b_fc padded
                       out_ref,     # VMEM (B, Op)     f32    output projection
                       h_out_ref,   # VMEM (B, Hp)     f32    new hidden (HBM-aliased with h input)
                       xh_ref):     # VMEM (B, 2*Hp)   f32    scratch: concatenated [x, h]
    B, Hp = h_ref.shape

    # Fused embedding gather: xh[:, :Hp] = emb[ids], xh[:, Hp:] = h.
    # B is small and static -> fully unrolled; each row is a dynamic leading-dim tile read.
    for b in range(B):
        xh_ref[pl.ds(b, 1), :Hp] = emb_ref[ids_ref[b]]      # (1, Hp) row copy
    xh_ref[:, Hp:] = h_ref[...]

    # Fused RNN cell: one MXU matmul covers both the input and recurrent projections.
    #   h' = tanh([x, h] @ [W_ih ; W_hh] + (b_ih + b_hh))
    h_new = jnp.tanh(
        jnp.dot(xh_ref[...], w_cat_ref[...], preferred_element_type=jnp.float32)
        + b_cat_ref[...])
    h_out_ref[...] = h_new

    # Output projection: out = h' @ W_fc + b_fc   (lane-dense (B, Op) store)
    out_ref[...] = (jnp.dot(h_new, w_fc_ref[...], preferred_element_type=jnp.float32)
                    + b_fc_ref[...])


def init_params(key, input_size, hidden_size, output_size):
    """Deterministic synthetic init (PyTorch-style uniform(-1/sqrt(H), 1/sqrt(H)))."""
    ks = jax.random.split(key, 7)
    stdv = 1.0 / jnp.sqrt(hidden_size)
    return {
        # nn.Embedding(input_size, hidden_size): weight (V, H) ~ N(0, 1)
        "emb": jax.random.normal(ks[0], (input_size, hidden_size), jnp.float32),
        # nn.RNN weights stored pre-transposed as (in, out)
        "w_ih": jax.random.uniform(ks[1], (hidden_size, hidden_size), jnp.float32, -stdv, stdv),
        "b_ih": jax.random.uniform(ks[2], (hidden_size,), jnp.float32, -stdv, stdv),
        "w_hh": jax.random.uniform(ks[3], (hidden_size, hidden_size), jnp.float32, -stdv, stdv),
        "b_hh": jax.random.uniform(ks[4], (hidden_size,), jnp.float32, -stdv, stdv),
        # nn.Linear(hidden_size, output_size), stored transposed (H, O)
        "w_fc": jax.random.uniform(ks[5], (hidden_size, output_size), jnp.float32, -stdv, stdv),
        "b_fc": jax.random.uniform(ks[6], (output_size,), jnp.float32, -stdv, stdv),
    }


def prepare_padded_params(p, lane=LANE):
    """One-time packing: pad lane dims to multiples of 128 and fuse the RNN-cell weights/biases."""
    V, H = p["emb"].shape
    O = p["w_fc"].shape[1]
    Hp = _round_up(H, lane)
    Op = _round_up(O, lane)
    # Embedding rows become individually-addressable (1, Hp) tiles for in-kernel gather.
    emb_p = jnp.zeros((V, 1, Hp), jnp.float32).at[:, 0, :H].set(p["emb"])
    w_ih_p = jnp.zeros((Hp, Hp), jnp.float32).at[:H, :H].set(p["w_ih"])
    w_hh_p = jnp.zeros((Hp, Hp), jnp.float32).at[:H, :H].set(p["w_hh"])
    w_cat = jnp.concatenate([w_ih_p, w_hh_p], axis=0)                     # (2*Hp, Hp)
    b_cat = jnp.zeros((1, Hp), jnp.float32).at[0, :H].set(p["b_ih"] + p["b_hh"])
    w_fc_p = jnp.zeros((Hp, Op), jnp.float32).at[:H, :O].set(p["w_fc"])
    b_fc_p = jnp.zeros((1, Op), jnp.float32).at[0, :O].set(p["b_fc"])
    return {"emb": emb_p, "w_cat": w_cat, "b_cat": b_cat, "w_fc": w_fc_p, "b_fc": b_fc_p}


@functools.partial(jax.jit, static_argnums=(3,))
def vanilla_rnn_forward(token_ids, hidden, padded, output_size):
    """token_ids: int array (any shape; flattened like input.view(1, -1));
       hidden: (n_layers=1, B, H).  Returns (output (B, O), hidden (1, B, H))."""
    ids = token_ids.reshape(-1).astype(jnp.int32)        # seq_len = 1, batch = B
    B = ids.shape[0]
    h0 = hidden[0]                                       # (B, H), n_layers = 1
    H = h0.shape[-1]
    Hp = padded["w_cat"].shape[1]
    Op = padded["w_fc"].shape[1]
    O = output_size

    # Zero-padded hidden columns stay exactly zero through the recurrence (padded weight rows
    # and biases are zero), so padding here is lossless.
    h0_p = jnp.pad(h0, ((0, 0), (0, Hp - H)))

    smem = pl.BlockSpec(memory_space=pltpu.MemorySpace.SMEM)
    vmem = pl.BlockSpec(memory_space=pltpu.MemorySpace.VMEM)

    out_p, h_new_p = pl.pallas_call(
        vanilla_rnn_kernel,
        out_shape=(jax.ShapeDtypeStruct((B, Op), jnp.float32),
                   jax.ShapeDtypeStruct((B, Hp), jnp.float32)),
        in_specs=[smem, vmem, vmem, vmem, vmem, vmem, vmem],
        out_specs=(vmem, vmem),
        scratch_shapes=[pltpu.VMEM((B, 2 * Hp), jnp.float32)],
        input_output_aliases={2: 1},                     # padded h0 buffer reused for h'
    )(ids, padded["emb"], h0_p, padded["w_cat"], padded["b_cat"],
      padded["w_fc"], padded["b_fc"])

    return out_p[:, :O], h_new_p[None, :, :H]


def reference_forward(token_ids, hidden, p):
    """Pure-JAX reference mirroring the PyTorch forward."""
    ids = token_ids.reshape(-1)
    x = jnp.take(p["emb"], ids, axis=0)
    h0 = hidden[0]
    h_new = jnp.tanh(x @ p["w_ih"] + p["b_ih"] + h0 @ p["w_hh"] + p["b_hh"])
    out = h_new @ p["w_fc"] + p["b_fc"]
    return out, h_new[None]


if __name__ == "__main__":
    input_size = 16    # vocab size
    hidden_size = 32
    output_size = 16
    n_layers = 1
    batch = 8          # numel of `input` after view(1, -1)

    key = jax.random.PRNGKey(0)
    k_tok, k_param = jax.random.split(key)

    params = init_params(k_param, input_size, hidden_size, output_size)
    padded = prepare_padded_params(params)
    token_ids = jax.random.randint(k_tok, (batch,), 0, input_size, dtype=jnp.int32)
    hidden = jnp.zeros((n_layers, batch, hidden_size), jnp.float32)   # init_hidden (batched)

    # Step 1 (zero hidden) and step 2 (non-zero recurrent hidden) to exercise both matmul paths.
    out1, h1 = vanilla_rnn_forward(token_ids, hidden, padded, output_size)
    out2, h2 = vanilla_rnn_forward(token_ids, h1, padded, output_size)
    jax.block_until_ready((out1, h1, out2, h2))

    out1_r, h1_r = reference_forward(token_ids, hidden, params)
    out2_r, h2_r = reference_forward(token_ids, h1_r, params)

    assert out1.shape == (batch, output_size) and h1.shape == (n_layers, batch, hidden_size)
    assert out2.shape == (batch, output_size) and h2.shape == (n_layers, batch, hidden_size)
    assert jnp.allclose(out1, out1_r, atol=1e-5), float(jnp.max(jnp.abs(out1 - out1_r)))
    assert jnp.allclose(h1, h1_r, atol=1e-5), float(jnp.max(jnp.abs(h1 - h1_r)))
    assert jnp.allclose(out2, out2_r, atol=1e-5), float(jnp.max(jnp.abs(out2 - out2_r)))
    assert jnp.allclose(h2, h2_r, atol=1e-5), float(jnp.max(jnp.abs(h2 - h2_r)))

    print("KERNEL_OK")
</pallas_src>

<mosaic_0001>
module attributes {stable_mosaic.version = 11 : i64} {
  func.func @vanilla_rnn_kernel(%arg0: memref<8xi32, #tpu.memory_space<smem>>, %arg1: memref<16x1x128xf32, #tpu.memory_space<vmem>>, %arg2: memref<8x128xf32, #tpu.memory_space<vmem>>, %arg3: memref<256x128xf32, #tpu.memory_space<vmem>>, %arg4: memref<1x128xf32, #tpu.memory_space<vmem>>, %arg5: memref<128x128xf32, #tpu.memory_space<vmem>>, %arg6: memref<1x128xf32, #tpu.memory_space<vmem>>, %arg7: memref<8x128xf32, #tpu.memory_space<vmem>>, %arg8: memref<8x128xf32, #tpu.memory_space<vmem>>, %arg9: memref<8x256xf32, #tpu.memory_space<vmem>>) attributes {dimension_semantics = [], scalar_prefetch = 0 : i64, scratch_operands = 1 : i64, tpu.core_type = #tpu.core_type<tc>} {
    %c0 = arith.constant 0 : index
    %0 = memref.load %arg0[%c0] : memref<8xi32, #tpu.memory_space<smem>>
    %1 = arith.index_cast %0 : i32 to index
    %c0_0 = arith.constant 0 : index
    %c0_1 = arith.constant 0 : index
    %2 = vector.load %arg1[%1, %c0_0, %c0_1] : memref<16x1x128xf32, #tpu.memory_space<vmem>>, vector<1x1x128xf32>
    %3 = vector.shape_cast %2 : vector<1x1x128xf32> to vector<1x128xf32>
    %c0_2 = arith.constant 0 : index
    %c0_3 = arith.constant 0 : index
    %4 = vector.load %arg9[%c0_2, %c0_3] : memref<8x256xf32, #tpu.memory_space<vmem>>, vector<1x128xf32>
    tpu.vector_store %arg9[%c0_2, %c0_3], %3 {strides = array<i32>} : memref<8x256xf32, #tpu.memory_space<vmem>>, vector<1x128xf32>,
    %c1 = arith.constant 1 : index
    %5 = memref.load %arg0[%c1] : memref<8xi32, #tpu.memory_space<smem>>
    %6 = arith.index_cast %5 : i32 to index
    %c0_4 = arith.constant 0 : index
    %c0_5 = arith.constant 0 : index
    %7 = vector.load %arg1[%6, %c0_4, %c0_5] : memref<16x1x128xf32, #tpu.memory_space<vmem>>, vector<1x1x128xf32>
    %8 = vector.shape_cast %7 : vector<1x1x128xf32> to vector<1x128xf32>
    %c1_6 = arith.constant 1 : index
    %c0_7 = arith.constant 0 : index
    %9 = vector.load %arg9[%c1_6, %c0_7] : memref<8x256xf32, #tpu.memory_space<vmem>>, vector<1x128xf32>
    tpu.vector_store %arg9[%c1_6, %c0_7], %8 {strides = array<i32>} : memref<8x256xf32, #tpu.memory_space<vmem>>, vector<1x128xf32>,
    %c2 = arith.constant 2 : index
    %10 = memref.load %arg0[%c2] : memref<8xi32, #tpu.memory_space<smem>>
    %11 = arith.index_cast %10 : i32 to index
    %c0_8 = arith.constant 0 : index
    %c0_9 = arith.constant 0 : index
    %12 = vector.load %arg1[%11, %c0_8, %c0_9] : memref<16x1x128xf32, #tpu.memory_space<vmem>>, vector<1x1x128xf32>
    %13 = vector.shape_cast %12 : vector<1x1x128xf32> to vector<1x128xf32>
    %c2_10 = arith.constant 2 : index
    %c0_11 = arith.constant 0 : index
    %14 = vector.load %arg9[%c2_10, %c0_11] : memref<8x256xf32, #tpu.memory_space<vmem>>, vector<1x128xf32>
    tpu.vector_store %arg9[%c2_10, %c0_11], %13 {strides = array<i32>} : memref<8x256xf32, #tpu.memory_space<vmem>>, vector<1x128xf32>,
    %c3 = arith.constant 3 : index
    %15 = memref.load %arg0[%c3] : memref<8xi32, #tpu.memory_space<smem>>
    %16 = arith.index_cast %15 : i32 to index
    %c0_12 = arith.constant 0 : index
    %c0_13 = arith.constant 0 : index
    %17 = vector.load %arg1[%16, %c0_12, %c0_13] : memref<16x1x128xf32, #tpu.memory_space<vmem>>, vector<1x1x128xf32>
    %18 = vector.shape_cast %17 : vector<1x1x128xf32> to vector<1x128xf32>
    %c3_14 = arith.constant 3 : index
    %c0_15 = arith.constant 0 : index
    %19 = vector.load %arg9[%c3_14, %c0_15] : memref<8x256xf32, #tpu.memory_space<vmem>>, vector<1x128xf32>
    tpu.vector_store %arg9[%c3_14, %c0_15], %18 {strides = array<i32>} : memref<8x256xf32, #tpu.memory_space<vmem>>, vector<1x128xf32>,
    %c4 = arith.constant 4 : index
    %20 = memref.load %arg0[%c4] : memref<8xi32, #tpu.memory_space<smem>>
    %21 = arith.index_cast %20 : i32 to index
    %c0_16 = arith.constant 0 : index
    %c0_17 = arith.constant 0 : index
    %22 = vector.load %arg1[%21, %c0_16, %c0_17] : memref<16x1x128xf32, #tpu.memory_space<vmem>>, vector<1x1x128xf32>
    %23 = vector.shape_cast %22 : vector<1x1x128xf32> to vector<1x128xf32>
    %c4_18 = arith.constant 4 : index
    %c0_19 = arith.constant 0 : index
    %24 = vector.load %arg9[%c4_18, %c0_19] : memref<8x256xf32, #tpu.memory_space<vmem>>, vector<1x128xf32>
    tpu.vector_store %arg9[%c4_18, %c0_19], %23 {strides = array<i32>} : memref<8x256xf32, #tpu.memory_space<vmem>>, vector<1x128xf32>,
    %c5 = arith.constant 5 : index
    %25 = memref.load %arg0[%c5] : memref<8xi32, #tpu.memory_space<smem>>
    %26 = arith.index_cast %25 : i32 to index
    %c0_20 = arith.constant 0 : index
    %c0_21 = arith.constant 0 : index
    %27 = vector.load %arg1[%26, %c0_20, %c0_21] : memref<16x1x128xf32, #tpu.memory_space<vmem>>, vector<1x1x128xf32>
    %28 = vector.shape_cast %27 : vector<1x1x128xf32> to vector<1x128xf32>
    %c5_22 = arith.constant 5 : index
    %c0_23 = arith.constant 0 : index
    %29 = vector.load %arg9[%c5_22, %c0_23] : memref<8x256xf32, #tpu.memory_space<vmem>>, vector<1x128xf32>
    tpu.vector_store %arg9[%c5_22, %c0_23], %28 {strides = array<i32>} : memref<8x256xf32, #tpu.memory_space<vmem>>, vector<1x128xf32>,
    %c6 = arith.constant 6 : index
    %30 = memref.load %arg0[%c6] : memref<8xi32, #tpu.memory_space<smem>>
    %31 = arith.index_cast %30 : i32 to index
    %c0_24 = arith.constant 0 : index
    %c0_25 = arith.constant 0 : index
    %32 = vector.load %arg1[%31, %c0_24, %c0_25] : memref<16x1x128xf32, #tpu.memory_space<vmem>>, vector<1x1x128xf32>
    %33 = vector.shape_cast %32 : vector<1x1x128xf32> to vector<1x128xf32>
    %c6_26 = arith.constant 6 : index
    %c0_27 = arith.constant 0 : index
    %34 = vector.load %arg9[%c6_26, %c0_27] : memref<8x256xf32, #tpu.memory_space<vmem>>, vector<1x128xf32>
    tpu.vector_store %arg9[%c6_26, %c0_27], %33 {strides = array<i32>} : memref<8x256xf32, #tpu.memory_space<vmem>>, vector<1x128xf32>,
    %c7 = arith.constant 7 : index
    %35 = memref.load %arg0[%c7] : memref<8xi32, #tpu.memory_space<smem>>
    %36 = arith.index_cast %35 : i32 to index
    %c0_28 = arith.constant 0 : index
    %c0_29 = arith.constant 0 : index
    %37 = vector.load %arg1[%36, %c0_28, %c0_29] : memref<16x1x128xf32, #tpu.memory_space<vmem>>, vector<1x1x128xf32>
    %38 = vector.shape_cast %37 : vector<1x1x128xf32> to vector<1x128xf32>
    %c7_30 = arith.constant 7 : index
    %c0_31 = arith.constant 0 : index
    %39 = vector.load %arg9[%c7_30, %c0_31] : memref<8x256xf32, #tpu.memory_space<vmem>>, vector<1x128xf32>
    tpu.vector_store %arg9[%c7_30, %c0_31], %38 {strides = array<i32>} : memref<8x256xf32, #tpu.memory_space<vmem>>, vector<1x128xf32>,
    %c0_32 = arith.constant 0 : index
    %c0_33 = arith.constant 0 : index
    %40 = vector.load %arg2[%c0_32, %c0_33] : memref<8x128xf32, #tpu.memory_space<vmem>>, vector<8x128xf32>
    %c0_34 = arith.constant 0 : index
    %c128 = arith.constant 128 : index
    %41 = vector.load %arg9[%c0_34, %c128] : memref<8x256xf32, #tpu.memory_space<vmem>>, vector<8x128xf32>
    tpu.vector_store %arg9[%c0_34, %c128], %40 {strides = array<i32>} : memref<8x256xf32, #tpu.memory_space<vmem>>, vector<8x128xf32>,
    %c0_35 = arith.constant 0 : index
    %c0_36 = arith.constant 0 : index
    %42 = vector.load %arg9[%c0_35, %c0_36] : memref<8x256xf32, #tpu.memory_space<vmem>>, vector<8x256xf32>
    %c0_37 = arith.constant 0 : index
    %c0_38 = arith.constant 0 : index
    %43 = vector.load %arg3[%c0_37, %c0_38] : memref<256x128xf32, #tpu.memory_space<vmem>>, vector<256x128xf32>
    %cst = arith.constant dense<0.000000e+00> : vector<8x128xf32>
    %44 = tpu.matmul %42, %43, %cst {dimension_numbers = #tpu.dot_dimension_numbers<[1], [0], [0], [1], [0, 0, 1, 1], [], []>} : vector<8x256xf32>, vector<256x128xf32>, vector<8x128xf32> -> vector<8x128xf32>
    %c0_39 = arith.constant 0 : index
    %c0_40 = arith.constant 0 : index
    %45 = vector.load %arg4[%c0_39, %c0_40] : memref<1x128xf32, #tpu.memory_space<vmem>>, vector<1x128xf32>
    %46 = vector.broadcast %45 : vector<1x128xf32> to vector<8x128xf32>
    %47 = arith.addf %44, %46 : vector<8x128xf32>
    %48 = math.tanh %47 : vector<8x128xf32>
    %c0_41 = arith.constant 0 : index
    %c0_42 = arith.constant 0 : index
    %49 = vector.load %arg8[%c0_41, %c0_42] : memref<8x128xf32, #tpu.memory_space<vmem>>, vector<8x128xf32>
    tpu.vector_store %arg8[%c0_41, %c0_42], %48 {strides = array<i32>} : memref<8x128xf32, #tpu.memory_space<vmem>>, vector<8x128xf32>,
    %c0_43 = arith.constant 0 : index
    %c0_44 = arith.constant 0 : index
    %50 = vector.load %arg5[%c0_43, %c0_44] : memref<128x128xf32, #tpu.memory_space<vmem>>, vector<128x128xf32>
    %cst_45 = arith.constant dense<0.000000e+00> : vector<8x128xf32>
    %51 = tpu.matmul %48, %50, %cst_45 {dimension_numbers = #tpu.dot_dimension_numbers<[1], [0], [0], [1], [0, 0, 1, 1], [], []>} : vector<8x128xf32>, vector<128x128xf32>, vector<8x128xf32> -> vector<8x128xf32>
    %c0_46 = arith.constant 0 : index
    %c0_47 = arith.constant 0 : index
    %52 = vector.load %arg6[%c0_46, %c0_47] : memref<1x128xf32, #tpu.memory_space<vmem>>, vector<1x128xf32>
    %53 = vector.broadcast %52 : vector<1x128xf32> to vector<8x128xf32>
    %54 = arith.addf %51, %53 : vector<8x128xf32>
    %c0_48 = arith.constant 0 : index
    %c0_49 = arith.constant 0 : index
    %55 = vector.load %arg7[%c0_48, %c0_49] : memref<8x128xf32, #tpu.memory_space<vmem>>, vector<8x128xf32>
    tpu.vector_store %arg7[%c0_48, %c0_49], %54 {strides = array<i32>} : memref<8x128xf32, #tpu.memory_space<vmem>>, vector<8x128xf32>,
    return
  }
}

</mosaic_0001>

<bundles_post_ra>
// kernel: vanilla_rnn_forward.1
= control target key start
LH: loop header
LB: loop body
LE: loop exit
PB: predicated region body
PF: predicated region fallthrough
CT: control target
= control target key end

     0   :  { %14 = vsyncpa [#allocation6], 0  ;;  %s750_s0 = inlined_call_operand.vmem [shape: s32[8], index: 0, kind: input, shape index: {}]   ;;  %s751_s1 = inlined_call_operand.vmem [shape: f32[16,1,128], index: 1, kind: input, shape index: {}]   ;;  %s752_s2 = inlined_call_operand.vmem [shape: f32[8,128], index: 2, kind: input, shape index: {}, may-alias: {2,8}]   ;;  %s753_s3 = inlined_call_operand.hbm [shape: f32[256,128], index: 3, kind: input, shape index: {}]   ;;  %s754_s4 = inlined_call_operand.vmem [shape: f32[1,128], index: 4, kind: input, shape index: {}]   ;;  %s755_s5 = inlined_call_operand.hbm [shape: f32[128,128], index: 5, kind: input, shape index: {}]   ;;  %s756_s6 = inlined_call_operand.vmem [shape: f32[1,128], index: 6, kind: input, shape index: {}]   ;;  %s757_s7 = inlined_call_operand.hbm [shape: f32[8,128], index: 7, kind: output, shape index: {0}]   ;;  %s758_s8 = inlined_call_operand.vmem [shape: f32[8,128], index: 8, kind: output, shape index: {1}, may-alias: {2,8}]  }
   0x1   :  { %15 = vsyncpa [#allocation4], 0 }
   0x2   :  { %16 = vsyncpa [#allocation9], 0 }
   0x3   :  { %17 = vsyncpa [#allocation5], 0  ;;  %s24_s29 = sshll.u32 %s750_s0, 4  ;;  %s25_s29 = int_to_ptr.vmem [resolvable:$true] %s24_s29 }
   0x4   :  { %s503_s30 = scalar_lea.vmem %s25_s29, 16  ;;  %p508_p1 = scmp.lt.s32.totalorder %s25_s29, %s25_s29 }
   0x5   :  { %p504_p0 = scmp.ne.s32.totalorder %s25_s29, %s503_s30  ;;  %p509_p2 = scmp.lt.s32.totalorder %s503_s30, %s503_s30 }
   0x7   :  { %p510_p3 = por %p509_p2, %p508_p1 }
   0x9   :  { %p511_p4 = pnand %p510_p3, %p504_p0 }
   0xb   :  { %514 = shalt.err (!%p511_p4)
}
   0xc   :  { %s589_s9 = smov [#allocation3]   ;;  %s590_s10 = smov [#allocation7]  }
   0xd   :  { %27 = dma.vmem_to_smem %s25_s29, 16, %s589_s9, [#allocation6]  }
   0xe   :  { %s37_s11 = sshll.u32 %s590_s10, 4  ;;  %s515_s14 = scalar_lea.hbm %s753_s3, 4096  ;;  %s38_s11 = int_to_ptr.vmem [resolvable:$true] %s37_s11 }
   0xf   :  { %p516_p5 = scmp.ne.s32.totalorder %s753_s3, %s515_s14  ;;  %p519_p6 = scmp.lt.u32.totalorder %s515_s14, %s753_s3 }
  0x11   :  { %p521_p7 = pnand %p519_p6, %p516_p5 }
  0x13   :  { %524 = shalt.err (!%p521_p7)
}
  0x14   :  { %s525_s18 = scalar_lea.vmem %s38_s11, 4096  ;;  %p530_p9 = scmp.lt.s32.totalorder %s38_s11, %s38_s11 }
  0x15   :  { %p526_p8 = scmp.ne.s32.totalorder %s38_s11, %s525_s18  ;;  %p531_p10 = scmp.lt.s32.totalorder %s525_s18, %s525_s18 }
  0x17   :  { %p532_p11 = por %p531_p10, %p530_p9 }
  0x19   :  { %p533_p12 = pnand %p532_p11, %p526_p8 }
  0x1b   :  { %536 = shalt.err (!%p533_p12)
}
  0x1c   :  { %s591_s19 = smov 128   ;;  %s592_s20 = smov 8  }
  0x1d   :  { %43 = dma.hbm_to_vmem [thread:$0]  %s753_s3, 4096, %s38_s11, [#allocation4], %s591_s19, %s591_s19, %s592_s20  }
  0x1e   :  { %s593_s23 = smov [#allocation8]   ;;  %s537_s27 = scalar_lea.hbm %s755_s5, 2048 }
  0x1f   :  { %s51_s24 = sshll.u32 %s593_s23, 4  ;;  %p538_p13 = scmp.ne.s32.totalorder %s755_s5, %s537_s27  ;;  %s52_s24 = int_to_ptr.vmem [resolvable:$true] %s51_s24 }
  0x20   :  { %p541_p0 = scmp.lt.u32.totalorder %s537_s27, %s755_s5 }
  0x22   :  { %p543_p1 = pnand %p541_p0, %p538_p13 }
  0x24   :  { %546 = shalt.err (!%p543_p1)
}
  0x25   :  { %s547_s10 = scalar_lea.vmem %s52_s24, 2048  ;;  %p552_p3 = scmp.lt.s32.totalorder %s52_s24, %s52_s24 }
  0x26   :  { %p548_p2 = scmp.ne.s32.totalorder %s52_s24, %s547_s10  ;;  %p553_p4 = scmp.lt.s32.totalorder %s547_s10, %s547_s10 }
  0x28   :  { %p554_p5 = por %p553_p4, %p552_p3 }
  0x2a   :  { %p555_p6 = pnand %p554_p5, %p548_p2 }
  0x2c   :  { %558 = shalt.err (!%p555_p6)
}
  0x2d   :  { %57 = dma.hbm_to_vmem [thread:$0]  %s755_s5, 2048, %s52_s24, [#allocation9], %s591_s19, %s591_s19, %s592_s20  }
  0x2e   :  { %581 = dma.done.wait [#allocation6], 16  }
  0x2f   :  { %582 = vsyncadd [#allocation6], 4294967280 }
  0x30   :  { %583 = dma.done.wait [#allocation4], 4096  }
  0x31   :  { %584 = vsyncadd [#allocation4], 4294963200 }
  0x32   :  { %585 = dma.done.wait [#allocation9], 2048  }
  0x33   :  { %586 = vsyncadd [#allocation9], 4294965248 }
  0x34   :  { %69 = sfence }
  0x35   :  { %v122_v0 = vld [vmem:[#allocation7 + $0x80] sm:$0xff]  ;;  %v123_v1 = vld [vmem:[#allocation7 + $0x88] sm:$0xff]  ;;  %s670_s12 = sld [smem:[#allocation3]]  ;;  %v124_v5 = vld [vmem:[#allocation7 + $0x90] sm:$0xff]  ;;  %s672_s13 = sld [smem:[#allocation3 + $0x1]]  ;;  %v594_v7 = vmov 0.0|0.0  }
  0x36   :  { %v106_v2 = vld [vmem:[#allocation7] sm:$0xff]  ;;  %v436_v3 = vpack.c.bf16 %v123_v1, %v122_v0  ;;  %v107_v4 = vld [vmem:[#allocation7 + $0x8] sm:$0xff]  ;;  %v125_v6 = vld [vmem:[#allocation7 + $0x98] sm:$0xff]  ;;  %468 = vmatprep.subr.bf16.mxu1 %v594_v7  ;;  %s675_s5 = sld [smem:[#allocation3 + $0x2]]  ;;  %s677_s14 = sld [smem:[#allocation3 + $0x3]]  ;;  %vm595_vm0 = vmmov 0  }
  0x37   :  { %v438_v8 = vpack.c.bf16 %v107_v4, %v106_v2  ;;  %v440_v9 = vpack.c.bf16 %v125_v6, %v124_v5  ;;  %v108_v10 = vld [vmem:[#allocation7 + $0x10] sm:$0xff]  ;;  %v109_v11 = vld [vmem:[#allocation7 + $0x18] sm:$0xff]  ;;  %v126_v12 = vld [vmem:[#allocation7 + $0xa0] sm:$0xff]  ;;  %s679_s15 = sld [smem:[#allocation3 + $0x4]]  ;;  %s681_s16 = sld [smem:[#allocation3 + $0x5]] }
  0x38   :  { %437 = vmatprep.subr.bf16.mxu0 %v436_v3  ;;  %v127_v13 = vld [vmem:[#allocation7 + $0xa8] sm:$0xff]  ;;  %v442_v14 = vpack.c.bf16 %v109_v11, %v108_v10  ;;  %v110_v16 = vld [vmem:[#allocation7 + $0x20] sm:$0xff]  ;;  %v128_v18 = vld [vmem:[#allocation7 + $0xb0] sm:$0xff]  ;;  %s683_s0 = sld [smem:[#allocation3 + $0x6]]  ;;  %s689_s20 = sld [smem:[#allocation3 + $0x7]] }
  0x39   :  { %439 = vmatpush3.bf16.msra.mxu0 %v438_v8  ;;  %v444_v15 = vpack.c.bf16 %v127_v13, %v126_v12  ;;  %v111_v17 = vld [vmem:[#allocation7 + $0x28] sm:$0xff]  ;;  %v129_v19 = vld [vmem:[#allocation7 + $0xb8] sm:$0xff]  ;;  %v112_v22 = vld [vmem:[#allocation7 + $0x30] sm:$0xff] }
  0x3a   :  { %441 = vmatprep.subr.bf16.mxu0 %v440_v9  ;;  %v446_v20 = vpack.c.bf16 %v111_v17, %v110_v16  ;;  %v448_v21 = vpack.c.bf16 %v129_v19, %v128_v18  ;;  %v113_v23 = vld [vmem:[#allocation7 + $0x38] sm:$0xff]  ;;  %v130_v24 = vld [vmem:[#allocation7 + $0xc0] sm:$0xff]  ;;  %v131_v25 = vld [vmem:[#allocation7 + $0xc8] sm:$0xff] }
  0x3b   :  { %s71_s19 = scalar_lea.vmem %s751_s1, %s670_s12  ;;  %s75_s23 = scalar_lea.vmem %s751_s1, %s672_s13  ;;  %v102_v26 = vld [vmem:[%s752_s2] sm:$0xff]  ;;  %v114_v27 = vld [vmem:[#allocation7 + $0x40] sm:$0xff]  ;;  %v115_v28 = vld [vmem:[#allocation7 + $0x48] sm:$0xff]  ;;  %v450_v32 = vpack.c.bf16 %v113_v23, %v112_v22  ;;  %v452_v38 = vpack.c.bf16 %v131_v25, %v130_v24 }
  0x3c   :  { %s79_s26 = scalar_lea.vmem %s751_s1, %s675_s5  ;;  %s83_s29 = scalar_lea.vmem %s751_s1, %s677_s14  ;;  %209 = vmatprep.mubr.f32.mxu0 %v102_v26  ;;  %v72_v29 = vld [vmem:[%s71_s19] sm:$0x1]  ;;  %v133_v34 = vld [vmem:[#allocation7 + $0xd8] sm:$0xff]  ;;  %v217_v40 = vld [vmem:[#allocation8] sm:$0xff]  ;;  %v454_v46 = vpack.c.bf16 %v115_v28, %v114_v27 }
  0x3d   :  { %443 = vmatpush3.bf16.msra.mxu0 %v442_v14  ;;  %s87_s11 = scalar_lea.vmem %s751_s1, %s679_s15  ;;  %v76_v30 = vld [vmem:[%s75_s23] sm:$0x1]  ;;  %s91_s5 = scalar_lea.vmem %s751_s1, %s681_s16  ;;  %73 = vst [vmem:[#allocation2] sm:$0x1] %v72_v29  ;;  %v218_v41 = vld [vmem:[#allocation8 + $0x8] sm:$0xff]  ;;  %v220_v45 = vld [vmem:[#allocation8 + $0x18] sm:$0xff] }
  0x3e   :  { %445 = vmatprep.subr.bf16.mxu0 %v444_v15  ;;  %v80_v31 = vld [vmem:[%s79_s26] sm:$0x1]  ;;  %77 = vst [vmem:[#allocation2 + $0x1] sm:$0x1] %v76_v30  ;;  %s95_s15 = scalar_lea.vmem %s751_s1, %s683_s0  ;;  %s99_s18 = scalar_lea.vmem %s751_s1, %s689_s20  ;;  %v469_v43 = vpack.c.bf16 %v218_v41, %v217_v40  ;;  %v117_v50 = vld [vmem:[#allocation7 + $0x58] sm:$0xff]  ;;  %v221_v51 = vld [vmem:[#allocation8 + $0x20] sm:$0xff] }
  0x3f   :  { %v132_v33 = vld [vmem:[#allocation7 + $0xd0] sm:$0xff]  ;;  %81 = vst [vmem:[#allocation2 + $0x2] sm:$0x1] %v80_v31  ;;  %v222_v52 = vld [vmem:[#allocation8 + $0x28] sm:$0xff]  ;;  %v134_v53 = vld [vmem:[#allocation7 + $0xe0] sm:$0xff]  ;;  %s597_s23 = smov [#allocation10]  }
  0x40   :  { %v84_v35 = vld [vmem:[%s83_s29] sm:$0x1]  ;;  %470 = vmatpush3.bf16.msra.mxu1 %v469_v43  ;;  %v456_v49 = vpack.c.bf16 %v133_v34, %v132_v33  ;;  %v135_v54 = vld [vmem:[#allocation7 + $0xe8] sm:$0xff]  ;;  %v118_v56 = vld [vmem:[#allocation7 + $0x60] sm:$0xff]  ;;  %v475_v57 = vpack.c.bf16 %v222_v52, %v221_v51  ;;  %s317_s24 = sshll.u32 %s597_s23, 4  ;;  %s318_s24 = int_to_ptr.vmem [resolvable:$true] %s317_s24 }
  0x41   :  { %447 = vmatpush3.bf16.msra.mxu0 %v446_v20  ;;  %v88_v36 = vld [vmem:[%s87_s11] sm:$0x1]  ;;  %85 = vst [vmem:[#allocation2 + $0x3] sm:$0x1] %v84_v35  ;;  %471 = vmatprep.subr.bf16.mxu1 %v594_v7  ;;  %v460_v58 = vpack.c.bf16 %v135_v54, %v134_v53  ;;  %v119_v59 = vld [vmem:[#allocation7 + $0x68] sm:$0xff]  ;;  %v224_v61 = vld [vmem:[#allocation8 + $0x38] sm:$0xff]  ;;  %p564_p8 = scmp.lt.s32.totalorder %s318_s24, %s318_s24 }
  0x42   :  { %v92_v37 = vld [vmem:[%s91_s5] sm:$0x1]  ;;  %449 = vmatprep.subr.bf16.mxu0 %v448_v21  ;;  %89 = vst [vmem:[#allocation2 + $0x4] sm:$0x1] %v88_v36  ;;  %v137_v63 = vld [vmem:[#allocation7 + $0xf8] sm:$0xff]  ;;  %v462_v0 = vpack.c.bf16 %v119_v59, %v118_v56  ;;  %v225_v8 = vld [vmem:[#allocation8 + $0x40] sm:$0xff] }
  0x43   :  { %93 = vst [vmem:[#allocation2 + $0x5] sm:$0x1] %v92_v37  ;;  %v96_v39 = vld [vmem:[%s95_s15] sm:$0x1]  ;;  %v121_v4 = vld [vmem:[#allocation7 + $0x78] sm:$0xff]  ;;  %v226_v9 = vld [vmem:[#allocation8 + $0x48] sm:$0xff] }
  0x44   :  { %97 = vst [vmem:[#allocation2 + $0x6] sm:$0x1] %v96_v39  ;;  %v100_v42 = vld [vmem:[%s99_s18] sm:$0x1]  ;;  %v481_v10 = vpack.c.bf16 %v226_v9, %v225_v8  ;;  %v228_v12 = vld [vmem:[#allocation8 + $0x58] sm:$0xff]  ;;  %v229_v14 = vld [vmem:[#allocation8 + $0x60] sm:$0xff] }
  0x45   :  { %v219_v44 = vld [vmem:[#allocation8 + $0x10] sm:$0xff]  ;;  %101 = vst [vmem:[#allocation2 + $0x7] sm:$0x1] %v100_v42  ;;  %451 = vmatpush3.bf16.msra.mxu0 %v450_v32  ;;  %v230_v15 = vld [vmem:[#allocation8 + $0x68] sm:$0xff]  ;;  %v232_v18 = vld [vmem:[#allocation8 + $0x78] sm:$0xff]  ;;  %v596_v20 = vmov 0.0  }
  0x46   :  { %v116_v47 = vld [vmem:[#allocation7 + $0x50] sm:$0xff]  ;;  %v472_v48 = vpack.c.bf16 %v220_v45, %v219_v44  ;;  %453 = vmatprep.subr.bf16.mxu0 %v452_v38  ;;  %v487_v16 = vpack.c.bf16 %v230_v15, %v229_v14  ;;  %433 = vmatprep.mubr.msk.f32.mxu1 %vm595_vm0, %v596_v20 }
  0x47   :  { %v458_v55 = vpack.c.bf16 %v117_v50, %v116_v47  ;;  %v223_v60 = vld [vmem:[#allocation8 + $0x30] sm:$0xff] }
  0x48   :  { %473 = vmatpush3.bf16.msra.mxu1 %v472_v48  ;;  %v136_v62 = vld [vmem:[#allocation7 + $0xf0] sm:$0xff]  ;;  %v478_v1 = vpack.c.bf16 %v224_v61, %v223_v60 }
  0x49   :  { %455 = vmatpush3.bf16.msra.mxu0 %v454_v46  ;;  %474 = vmatprep.subr.bf16.mxu1 %v594_v7  ;;  %v464_v2 = vpack.c.bf16 %v137_v63, %v136_v62  ;;  %v120_v3 = vld [vmem:[#allocation7 + $0x70] sm:$0xff] }
  0x4a   :  { %457 = vmatprep.subr.bf16.mxu0 %v456_v49  ;;  %v466_v5 = vpack.c.bf16 %v121_v4, %v120_v3  ;;  %v227_v11 = vld [vmem:[#allocation8 + $0x50] sm:$0xff] }
  0x4b   :  { %v484_v13 = vpack.c.bf16 %v228_v12, %v227_v11  ;;  %v231_v17 = vld [vmem:[#allocation8 + $0x70] sm:$0xff] }
  0x4c   :  { %476 = vmatpush3.bf16.msra.mxu1 %v475_v57  ;;  %v104_v6 = vld [vmem:[#allocation2] sm:$0xff]  ;;  %v490_v19 = vpack.c.bf16 %v232_v18, %v231_v17 }
  0x4d   :  { %459 = vmatpush3.bf16.msra.mxu0 %v458_v55  ;;  %477 = vmatprep.subr.bf16.mxu1 %v594_v7  ;;  %v347_v22 = vld [vmem:[%s754_s4] ss:$0 sm:$0xff]  ;;  %s559_s4 = scalar_lea.vmem %s318_s24, 128 }
  0x4e   :  { %461 = vmatprep.subr.bf16.mxu0 %v460_v58  ;;  %p560_p7 = scmp.ne.s32.totalorder %s318_s24, %s559_s4  ;;  %p565_p9 = scmp.lt.s32.totalorder %s559_s4, %s559_s4 }
  0x50   :  { %479 = vmatpush3.bf16.msra.mxu1 %v478_v1  ;;  %p566_p10 = por %p565_p9, %p564_p8 }
  0x51   :  { %463 = vmatpush3.bf16.msra.mxu0 %v462_v0  ;;  %480 = vmatprep.subr.bf16.mxu1 %v594_v7 }
  0x52   :  { %465 = vmatprep.subr.bf16.mxu0 %v464_v2  ;;  %p567_p11 = pnand %p566_p10, %p560_p7 }
  0x54   :  { %482 = vmatpush3.bf16.msra.mxu1 %v481_v10 }
  0x55   :  { %467 = vmatpush3.bf16.msra.mxu0 %v466_v5  ;;  %483 = vmatprep.subr.bf16.mxu1 %v594_v7 }
  0x58   :  { %210 = vmatmul.mubr.f32.vlgmr.msra.gmra.mrb[0].mxu0 %v104_v6  ;;  %485 = vmatpush3.bf16.msra.mxu1 %v484_v13 }
  0x59   :  { %486 = vmatprep.subr.bf16.mxu1 %v594_v7 }
  0x5c   :  { %488 = vmatpush3.bf16.msra.mxu1 %v487_v16 }
  0x5d   :  { %489 = vmatprep.subr.bf16.mxu1 %v594_v7  ;;  %v348_v7 = vld [vmem:[%s756_s6] ss:$0 sm:$0xff] }
  0x60   :  { %491 = vmatpush3.bf16.msra.mxu1 %v490_v19 }
 0x12b   :  { %v381_v21 = vpop.f32.mrb[0].mxu0 }
 0x12c   :  { %v382_v23 = vpop.f32.mrb[1].mxu0 }
 0x12d   :  { %v383_v24 = vadd.f32 %v382_v23, %v381_v21 }
 0x12f   :  { %v212_v25 = vadd.f32 %v383_v24, %v347_v22 }
 0x131   :  { %501 = vtanh.f32 %v212_v25 }
 0x13b   :  { %v502_v26 = vpop.eup %501 }
 0x13c   :  { %216 = vst [vmem:[%s758_s8] sm:$0xff] %v502_v26  ;;  %434 = vmatmul.mubr.f32.vlgmr.msra.gmra.mrb[0].mxu1 %v502_v26 }
 0x20f   :  { %v306_v27 = vpop.f32.mrb[0].mxu1 }
 0x210   :  { %v307_v28 = vadd.f32 %v348_v7, %v306_v27  ;;  %v435_v29 = vpop.f32.mrb[1].mxu1 }
 0x212   :  { %310 = vst [vmem:[#allocation10] sm:$0xff] %v307_v28 }
 0x213   :  { %570 = shalt.err (!%p567_p11)
}
 0x214   :  { %s571_s26 = scalar_lea.hbm %s757_s7, 128 }
 0x215   :  { %p572_p12 = scmp.ne.s32.totalorder %s757_s7, %s571_s26  ;;  %p575_p13 = scmp.lt.u32.totalorder %s571_s26, %s757_s7 }
 0x217   :  { %p577_p0 = pnand %p575_p13, %p572_p12 }
 0x219   :  { %580 = shalt.err (!%p577_p0)
}
 0x21a   :  { %320 = dma.vmem_to_hbm [thread:$0]  %s318_s24, 128, %s757_s7, [#allocation5]  }
 0x21b   :  { %587 = dma.done.wait [#allocation5], 128  }
 0x21c   :  { %588 = vsyncadd [#allocation5], 4294967168 }
 0x21d   :  { %328 = vsyncpa [#allocation4], 1 }
 0x21e   :  { %329 = vsyncpa [#allocation9], 1 }
 0x21f   :  { %330 = vsyncpa [#allocation5], 1 }
 0x220   :  { %331 = vsyncpa [#allocation6], 1 }

</bundles_post_ra>
